<compile_context>
chip_gen: v6e
topology: v6e:2x2x1
jax: 0.10.0
libtpu: 0.0.40
codegen_flags: <defaults>
</compile_context>

<pallas_src>
import jax
import jax.numpy as jnp
from jax.experimental import pallas as pl
from jax.experimental.pallas import tpu as pltpu
import numpy as np


def autopad(k, p=None):
    if p is None:
        p = k // 2 if isinstance(k, int) else [x // 2 for x in k]
    return p


def _round_up(x, m):
    return ((x + m - 1) // m) * m


# ---------------------------------------------------------------------------
# Pallas kernel: tiled matmul + per-channel bias + SiLU
# (BatchNorm scale is pre-folded into the weights in the wrapper.)
# ---------------------------------------------------------------------------
def _matmul_bias_silu_kernel(p_ref, w_ref, b_ref, o_ref, acc_ref):
    # p_ref: (TM, TK) bf16   w_ref: (TK, TN) bf16
    # b_ref: (1, TN)  f32    o_ref: (TM, TN) f32    acc_ref: (TM, TN) f32
    @pl.when(pl.program_id(2) == 0)
    def _():
        acc_ref[...] = jnp.zeros_like(acc_ref)

    acc_ref[...] += jnp.dot(p_ref[...], w_ref[...],
                            preferred_element_type=jnp.float32)

    @pl.when(pl.program_id(2) == pl.num_programs(2) - 1)
    def _():
        y = acc_ref[...] + b_ref[...]
        # SiLU: y * sigmoid(y); reciprocal routed to the EUP (approx).
        o_ref[...] = (y * pl.reciprocal(1.0 + jnp.exp(-y),
                                        approx=True)).astype(o_ref.dtype)


def _pick_tile(dim, target):
    """Pad `dim` to a lane-friendly size and pick a tile that divides it.

    `target` must be a multiple of 128.
    """
    padded = _round_up(dim, 128)
    if padded <= target:
        return padded, padded
    padded = _round_up(dim, target)
    return padded, target


def _fused_matmul_bias_silu(patches, w_mat, bias, *, tm=512, tn=256, tk=512):
    """silu(patches @ w_mat + bias), tiled over (M, C2, K) with f32 accumulator."""
    M, K = patches.shape
    C2 = w_mat.shape[1]

    Mp, TM = _pick_tile(M, tm)
    Kp, TK = _pick_tile(K, tk)
    Np, TN = _pick_tile(C2, tn)

    # bf16 MXU inputs (halves HBM traffic for the expanded im2col matrix);
    # zero padding keeps the matmul result exact for the valid region.
    p_pad = jnp.pad(patches.astype(jnp.bfloat16), ((0, Mp - M), (0, Kp - K)))
    w_pad = jnp.pad(w_mat.astype(jnp.bfloat16), ((0, Kp - K), (0, Np - C2)))
    b_pad = jnp.pad(bias.astype(jnp.float32).reshape(1, C2),
                    ((0, 0), (0, Np - C2)))

    out = pl.pallas_call(
        _matmul_bias_silu_kernel,
        out_shape=jax.ShapeDtypeStruct((Mp, Np), jnp.float32),
        grid_spec=pltpu.PrefetchScalarGridSpec(
            num_scalar_prefetch=0,
            grid=(Mp // TM, Np // TN, Kp // TK),
            in_specs=[
                pl.BlockSpec((TM, TK), lambda i, j, k: (i, k)),
                pl.BlockSpec((TK, TN), lambda i, j, k: (k, j)),
                pl.BlockSpec((1, TN), lambda i, j, k: (0, j)),
            ],
            out_specs=pl.BlockSpec((TM, TN), lambda i, j, k: (i, j)),
            scratch_shapes=[pltpu.VMEM((TM, TN), jnp.float32)],
        ),
        compiler_params=pltpu.CompilerParams(
            dimension_semantics=("parallel", "parallel", "arbitrary"),
            vmem_limit_bytes=48 * 1024 * 1024,
        ),
    )(p_pad, w_pad, b_pad)
    return out[:M, :C2]


# ---------------------------------------------------------------------------
# Conv (+BN folded +SiLU) forward.  Core is NHWC; NCHW only at the boundary.
# ---------------------------------------------------------------------------
def conv_bn_silu_nhwc(x_nhwc, weight, gamma, beta, running_mean, running_var,
                      k=1, s=1, p=None, eps=1e-3, **tile_kwargs):
    """x_nhwc: (N, H, W, C1).  weight: (C2, C1, k, k).  Returns (N, Ho, Wo, C2)."""
    pad = autopad(k, p)
    N, H, W, C1 = x_nhwc.shape
    C2 = weight.shape[0]
    Ho = (H + 2 * pad - k) // s + 1
    Wo = (W + 2 * pad - k) // s + 1

    xpad = jnp.pad(x_nhwc, ((0, 0), (pad, pad), (pad, pad), (0, 0)))

    # im2col in NHWC: K flattening order is (kh, kw, c1).
    cols = []
    for kh in range(k):
        for kw in range(k):
            cols.append(xpad[:, kh:kh + Ho * s:s, kw:kw + Wo * s:s, :])
    patches = jnp.stack(cols, axis=3)                    # (N, Ho, Wo, k*k, C1)
    patches = patches.reshape(N * Ho * Wo, k * k * C1)   # (M, K)

    # weight (C2, C1, kh, kw) -> (kh, kw, C1, C2) -> (K, C2)
    w_mat = jnp.transpose(weight, (2, 3, 1, 0)).reshape(k * k * C1, C2)

    # Fold eval-mode BatchNorm: scale into weights, keep only bias for epilogue.
    inv_std = gamma / jnp.sqrt(running_var + eps)
    w_mat = w_mat * inv_std[None, :]
    bias = beta - running_mean * inv_std

    out = _fused_matmul_bias_silu(patches, w_mat, bias, **tile_kwargs)  # (M, C2)
    return out.reshape(N, Ho, Wo, C2)


def conv_forward(x_nchw, weight, gamma, beta, running_mean, running_var,
                 k=1, s=1, p=None, eps=1e-3, **tile_kwargs):
    """PyTorch-facing NCHW wrapper around the NHWC core."""
    x_nhwc = jnp.transpose(x_nchw, (0, 2, 3, 1))
    out = conv_bn_silu_nhwc(x_nhwc, weight, gamma, beta, running_mean,
                            running_var, k=k, s=s, p=p, eps=eps, **tile_kwargs)
    return jnp.transpose(out, (0, 3, 1, 2))


# ---------------------------------------------------------------------------
# References for the self-check
# ---------------------------------------------------------------------------
def conv_forward_ref(x, weight, gamma, beta, running_mean, running_var,
                     k=1, s=1, p=None, eps=1e-3):
    """Pure-f32 Conv -> BN(eval) -> SiLU (module semantics)."""
    pad = autopad(k, p)
    y = jax.lax.conv_general_dilated(
        x, weight, window_strides=(s, s),
        padding=((pad, pad), (pad, pad)),
        dimension_numbers=("NCHW", "OIHW", "NCHW"))
    sc = gamma / jnp.sqrt(running_var + eps)
    y = y * sc[None, :, None, None] + (beta - running_mean * sc)[None, :, None, None]
    return y * jax.nn.sigmoid(y)


def conv_forward_ref_bf16(x, weight, gamma, beta, running_mean, running_var,
                          k=1, s=1, p=None, eps=1e-3):
    """Numerics-matched reference: BN scale folded, bf16 inputs, f32 accumulation."""
    pad = autopad(k, p)
    inv_std = gamma / jnp.sqrt(running_var + eps)
    w_scaled = (weight * inv_std[:, None, None, None]).astype(jnp.bfloat16)
    y = jax.lax.conv_general_dilated(
        x.astype(jnp.bfloat16), w_scaled, window_strides=(s, s),
        padding=((pad, pad), (pad, pad)),
        dimension_numbers=("NCHW", "OIHW", "NCHW"),
        preferred_element_type=jnp.float32)
    y = y + (beta - running_mean * inv_std)[None, :, None, None]
    return y * jax.nn.sigmoid(y)


# ---------------------------------------------------------------------------
# Self-test
# ---------------------------------------------------------------------------
if __name__ == "__main__":
    key = jax.random.PRNGKey(0)

    def make_params(pkey, c1, c2, k):
        kw, kg, kb, km, kv = jax.random.split(pkey, 5)
        fan = c1 * k * k
        weight = jax.random.normal(kw, (c2, c1, k, k), jnp.float32) / np.sqrt(fan)
        gamma = 1.0 + 0.1 * jax.random.normal(kg, (c2,), jnp.float32)
        beta = 0.1 * jax.random.normal(kb, (c2,), jnp.float32)
        rmean = 0.1 * jax.random.normal(km, (c2,), jnp.float32)
        rvar = jax.random.uniform(kv, (c2,), jnp.float32, minval=0.5, maxval=1.5)
        return weight, gamma, beta, rmean, rvar

    # Layer configs drawn from Yolov7_model (first 3x3 stem, a stride-2 3x3, a 1x1),
    # at small spatial sizes. Small tiles on the first two cases exercise the
    # multi-block M grid and the K-reduction accumulator path.
    cases = [
        ("conv3x3_s1", (2, 3, 16, 16), 32, 3, 1, dict(tm=128, tn=128, tk=128)),
        ("conv3x3_s2", (2, 32, 16, 16), 64, 3, 2, dict(tm=128, tn=128, tk=128)),
        ("conv1x1_s1", (2, 128, 8, 8), 64, 1, 1, dict()),
    ]

    for name, xshape, c2, k, s, tiles in cases:
        key, kx, kp = jax.random.split(key, 3)
        x = jax.random.normal(kx, xshape, jnp.float32)
        weight, gamma, beta, rmean, rvar = make_params(kp, xshape[1], c2, k)

        out = conv_forward(x, weight, gamma, beta, rmean, rvar, k=k, s=s, **tiles)
        out = jax.block_until_ready(out)

        # Tier 1: tight check vs numerics-matched (bf16-folded) reference.
        ref_bf16 = jax.block_until_ready(
            conv_forward_ref_bf16(x, weight, gamma, beta, rmean, rvar, k=k, s=s))
        assert out.shape == ref_bf16.shape, (name, out.shape, ref_bf16.shape)
        np.testing.assert_allclose(np.asarray(out), np.asarray(ref_bf16),
                                   rtol=5e-3, atol=5e-3, err_msg=name)

        # Tier 2: loose check vs pure-f32 Conv->BN->SiLU module semantics.
        ref_f32 = jax.block_until_ready(
            conv_forward_ref(x, weight, gamma, beta, rmean, rvar, k=k, s=s))
        np.testing.assert_allclose(np.asarray(out), np.asarray(ref_f32),
                                   rtol=3e-2, atol=6e-2, err_msg=name)

    print("KERNEL_OK")
</pallas_src>

<mosaic_0001>
module attributes {stable_mosaic.version = 11 : i64} {
  func.func @_matmul_bias_silu_kernel(%arg0: i32, %arg1: i32, %arg2: i32, %arg3: memref<128x128xbf16, #tpu.memory_space<vmem>>, %arg4: memref<128x128xbf16, #tpu.memory_space<vmem>>, %arg5: memref<1x128xf32, #tpu.memory_space<vmem>>, %arg6: memref<128x128xf32, #tpu.memory_space<vmem>>, %arg7: memref<128x128xf32, #tpu.memory_space<vmem>>) attributes {dimension_semantics = [#tpu.dimension_semantics<parallel>, #tpu.dimension_semantics<parallel>, #tpu.dimension_semantics<arbitrary>], iteration_bounds = array<i64: 4, 1, 1>, scalar_prefetch = 0 : i64, scratch_operands = 1 : i64, tpu.core_type = #tpu.core_type<tc>, window_params = [{transform_indices = @transform_0, window_bounds = array<i64: 128, 128>}, {transform_indices = @transform_1, window_bounds = array<i64: 128, 128>}, {transform_indices = @transform_2, window_bounds = array<i64: 1, 128>}, {transform_indices = @transform_3, window_bounds = array<i64: 128, 128>}]} {
    %c0_i32 = arith.constant 0 : i32
    %0 = arith.cmpi eq, %arg2, %c0_i32 : i32
    %1 = arith.extui %0 : i1 to i32
    %c0_i32_0 = arith.constant 0 : i32
    %2 = arith.cmpi ne, %1, %c0_i32_0 : i32
    scf.if %2 {
      %cst_10 = arith.constant 0.000000e+00 : f32
      %12 = vector.broadcast %cst_10 : f32 to vector<128x128xf32>
      %c0_11 = arith.constant 0 : index
      %c0_12 = arith.constant 0 : index
      %13 = vector.load %arg7[%c0_11, %c0_12] : memref<128x128xf32, #tpu.memory_space<vmem>>, vector<128x128xf32>
      tpu.vector_store %arg7[%c0_11, %c0_12], %12 {strides = array<i32>} : memref<128x128xf32, #tpu.memory_space<vmem>>, vector<128x128xf32>,
    } else {
    }
    %c0 = arith.constant 0 : index
    %c0_1 = arith.constant 0 : index
    %3 = vector.load %arg7[%c0, %c0_1] : memref<128x128xf32, #tpu.memory_space<vmem>>, vector<128x128xf32>
    %c0_2 = arith.constant 0 : index
    %c0_3 = arith.constant 0 : index
    %4 = vector.load %arg3[%c0_2, %c0_3] : memref<128x128xbf16, #tpu.memory_space<vmem>>, vector<128x128xbf16>
    %c0_4 = arith.constant 0 : index
    %c0_5 = arith.constant 0 : index
    %5 = vector.load %arg4[%c0_4, %c0_5] : memref<128x128xbf16, #tpu.memory_space<vmem>>, vector<128x128xbf16>
    %cst = arith.constant dense<0.000000e+00> : vector<128x128xf32>
    %6 = tpu.matmul %4, %5, %cst {dimension_numbers = #tpu.dot_dimension_numbers<[1], [0], [0], [1], [0, 0, 1, 1], [], []>} : vector<128x128xbf16>, vector<128x128xbf16>, vector<128x128xf32> -> vector<128x128xf32>
    %7 = arith.addf %3, %6 : vector<128x128xf32>
    %c0_6 = arith.constant 0 : index
    %c0_7 = arith.constant 0 : index
    %8 = vector.load %arg7[%c0_6, %c0_7] : memref<128x128xf32, #tpu.memory_space<vmem>>, vector<128x128xf32>
    tpu.vector_store %arg7[%c0_6, %c0_7], %7 {strides = array<i32>} : memref<128x128xf32, #tpu.memory_space<vmem>>, vector<128x128xf32>,
    %c0_i32_8 = arith.constant 0 : i32
    %9 = arith.cmpi eq, %arg2, %c0_i32_8 : i32
    %10 = arith.extui %9 : i1 to i32
    %c0_i32_9 = arith.constant 0 : i32
    %11 = arith.cmpi ne, %10, %c0_i32_9 : i32
    scf.if %11 {
      %c0_10 = arith.constant 0 : index
      %c0_11 = arith.constant 0 : index
      %12 = vector.load %arg7[%c0_10, %c0_11] : memref<128x128xf32, #tpu.memory_space<vmem>>, vector<128x128xf32>
      %c0_12 = arith.constant 0 : index
      %c0_13 = arith.constant 0 : index
      %13 = vector.load %arg5[%c0_12, %c0_13] : memref<1x128xf32, #tpu.memory_space<vmem>>, vector<1x128xf32>
      %14 = vector.broadcast %13 : vector<1x128xf32> to vector<128x128xf32>
      %15 = arith.addf %12, %14 : vector<128x128xf32>
      %cst_14 = arith.constant 0.000000e+00 : f32
      %16 = vector.broadcast %cst_14 : f32 to vector<128x128xf32>
      %17 = arith.subf %16, %15 : vector<128x128xf32>
      %18 = math.exp %17 : vector<128x128xf32>
      %cst_15 = arith.constant 1.000000e+00 : f32
      %19 = vector.broadcast %cst_15 : f32 to vector<128x128xf32>
      %20 = arith.addf %19, %18 : vector<128x128xf32>
      %21 = tpu.reciprocal %20 {approx = true} : vector<128x128xf32> -> vector<128x128xf32>
      %22 = arith.mulf %15, %21 : vector<128x128xf32>
      %c0_16 = arith.constant 0 : index
      %c0_17 = arith.constant 0 : index
      %23 = vector.load %arg6[%c0_16, %c0_17] : memref<128x128xf32, #tpu.memory_space<vmem>>, vector<128x128xf32>
      tpu.vector_store %arg6[%c0_16, %c0_17], %22 {strides = array<i32>} : memref<128x128xf32, #tpu.memory_space<vmem>>, vector<128x128xf32>,
    } else {
    }
    return
  }
  func.func @transform_0(%arg0: i32, %arg1: i32, %arg2: i32) -> (i32, i32) {
    %c0_i32 = arith.constant 0 : i32
    return %arg0, %arg2 : i32, i32
  }
  func.func @transform_1(%arg0: i32, %arg1: i32, %arg2: i32) -> (i32, i32) {
    %c0_i32 = arith.constant 0 : i32
    return %arg2, %arg1 : i32, i32
  }
  func.func @transform_2(%arg0: i32, %arg1: i32, %arg2: i32) -> (i32, i32) {
    %c0_i32 = arith.constant 0 : i32
    %c0_i32_0 = arith.constant 0 : i32
    return %c0_i32, %arg1 : i32, i32
  }
  func.func @transform_3(%arg0: i32, %arg1: i32, %arg2: i32) -> (i32, i32) {
    %c0_i32 = arith.constant 0 : i32
    return %arg0, %arg1 : i32, i32
  }
}

</mosaic_0001>

<bundles_post_ra>
// kernel: tpu_custom_call.1
= control target key start
LH: loop header
LB: loop body
LE: loop exit
PB: predicated region body
PF: predicated region fallthrough
CT: control target
= control target key end

     0   :  { %8 = vsyncpa [#allocation4], 0  ;;  %s1558_s0 = inlined_call_operand.hbm [shape: bf16[512,128], index: 0, kind: input, shape index: {}]   ;;  %s1559_s1 = inlined_call_operand.hbm [shape: bf16[128,128], index: 1, kind: input, shape index: {}]   ;;  %s1560_s2 = inlined_call_operand.vmem [shape: f32[1,128], index: 2, kind: input, shape index: {}]   ;;  %s1561_s3 = inlined_call_operand.hbm [shape: f32[512,128], index: 3, kind: output, shape index: {}]  }
   0x1   :  { %10 = vsyncpa [#allocation4 + $0x1], 0 }
   0x2   :  { %11 = vsyncpa [#allocation7], 0 }
   0x3   :  { %12 = vsyncpa [#allocation5], 0 }
   0x4   :  { %14 = vsyncpa [#allocation5 + $0x1], 0  ;;  %s1258_s12 = smov 0   ;;  %s1260_s13 = smov 0  }
   0x5   :  { %s1262_s14 = smov 0   ;;  %s1264_s15 = smov 0  }
   0x6   :  { %s1266_s16 = smov 0   ;;  %s1268_s17 = smov 0  }
   0x7 LB: > { %s833_s18 = sadd.s32 4294967295, %s1229_s17   ;;  %s834_s19 = sadd.s32 4294967294, %s1229_s17   ;;  %s1229_s17 = sphi %s1268_s17, %s20_s17   ;;  %s1225_s16 = sphi %s1266_s16, %s1582_s16   ;;  %s1221_s15 = sphi %s1264_s15, %s1581_s15   ;;  %s1217_s14 = sphi %s1262_s14, %s1580_s14   ;;  %s1213_s13 = sphi %s1260_s13, %s1579_s13   ;;  %s1209_s12 = sphi %s1258_s12, %s1578_s12  }
   0x8   : > { %p61_p0 = scmp.ne.s32.totalorder %s1213_s13, %s1209_s12  ;;  %p1292_p1 = scmp.eq.s32.totalorder %s833_s18, 0 }
   0x9   : > { %p1296_p2 = scmp.eq.s32.totalorder %s833_s18, 3  ;;  %p147_p3 = scmp.eq.s32.totalorder %s834_s19, 3 }
   0xa   : > { %p1302_p4 = por %p1292_p1, %p61_p0  ;;  %p835_p5 = scmp.ge.s32.totalorder %s1229_s17, 1 }
   0xb   : > { %p1307_p6 = por %p147_p3, %p61_p0  ;;  %p154_p7 = scmp.lt.s32.totalorder %s1229_s17, 5 }
   0xc   : > { %s1231_s25 = smov [#allocation6]   ;;  %s39_s28 = sadd.s32 1, %s1225_s16 }
   0xd   : > { %s1568_s23 = scalar_select %p1307_p6, 1, 0 }
   0xe   : > { %p1312_p8 = pnand %p835_p5, %p154_p7  ;;  %s170_s26 = sshll.u32 %s1231_s25, 4  ;;  %s171_s26 = int_to_ptr.vmem [resolvable:$true] %s170_s26 }
   0xf   : > { %s1102_s29 = scalar_lea.vmem %s171_s26, 1024  ;;  %p1110_p3 = scmp.lt.s32.totalorder %s171_s26, %s171_s26 }
  0x10   : > { %p942_p9 = pneg %p1312_p8  ;;  %p1103_p12 = scmp.ne.s32.totalorder %s171_s26, %s1102_s29 }
  0x11   : > { %p1111_p5 = scmp.lt.s32.totalorder %s1102_s29, %s1102_s29 }
  0x12   : > { %p1320_p10 = pnand %p942_p9, %p1292_p1 }
  0x13   : > { %p1112_p7 = por %p1111_p5, %p1110_p3 }
  0x14   : > { %p1093_p11 = pneg %p1320_p10 }
  0x16   : > { %p1105_p13 = pnand %p1103_p12, %p1093_p11 }
  0x18   : > { %p1106_p0 = pneg %p1105_p13 }
  0x1a   : > { %p1113_p6 = pnand %p1112_p7, %p1106_p0 }
  0x1c   : > { %1116 = shalt.err (!%p1113_p6)
}
  0x1d   : > { %s1562_s30 = smov 64   ;;  %s1563_s4 = smov 4  }
  0x1e   : > { %945 = dma.hbm_to_vmem [thread:$0]  (!%p1320_p10), %s1559_s1, 1024, %s171_s26, [#allocation7], %s1562_s30, %s1562_s30, %s1563_s4  }
  0x1f   : > { %p41_p6 = scmp.ge.s32.totalorder %s39_s28, 4  ;;  %s48_s7 = sadd.s32 1, %s1217_s14 }
  0x20   : > { %p55_p9 = scmp.ne.s32.totalorder %s1217_s14, %s1213_s13  ;;  %p56_p11 = scmp.eq.s32.totalorder %s1229_s17, 0 }
  0x21   : > { %s1584_s28 = smov (%p41_p6, %s39_s28), 0  ;;  %p955_p0 = scmp.lt.s32.totalorder %s1229_s17, 4 }
  0x22   : > { %p1341_p12 = por %p56_p11, %p55_p9  ;;  %p1347_p13 = por %p1296_p2, %p55_p9 }
  0x23   : > { %s43_s10 = ssub.s32 %s1225_s16, %s1584_s28  ;;  %s190_s11 = sand.u32 1, %s1217_s14  }
  0x24   : > { %s1572_s9 = scalar_select %p1347_p13, 1, 0 }
  0x25   : > { %p46_p10 = scmp.eq.s32.totalorder %s43_s10, 0  ;;  %s839_s18 = sshll.u32 %s190_s11, 6 }
  0x26   : > { %s868_s25 = sshll.u32 %s1225_s16, 10  ;;  %s194_s5 = scalar_lea.vmem [#allocation3], %s839_s18 }
  0x27   : > { %s1356_s19 = scalar_select %p46_p10, %s1217_s14, %s48_s7  }
  0x28   : > { %s201_s29 = scalar_lea.hbm %s1558_s0, %s868_s25  ;;  %s202_s6 = sshll.u32 %s194_s5, 4  ;;  %s203_s6 = int_to_ptr.vmem [resolvable:$true] %s202_s6 }
  0x29   : > { %p1364_p2 = pnand %p955_p0, %p1341_p12  ;;  %s191_s30 = scalar_lea.sflag [#allocation4], %s190_s11 }
  0x2a   : > { %s1130_s10 = scalar_lea.vmem %s203_s6, 1024  ;;  %s1234_s7 = smov [#allocation3]  }
  0x2b   : > { %p1119_p3 = pneg %p1364_p2  ;;  %p1131_p5 = scmp.ne.s32.totalorder %s203_s6, %s1130_s10 }
  0x2c   : > { %s1135_s4 = sshll.u32 %s1234_s7, 4  ;;  %s1136_s4 = int_to_ptr.vmem [resolvable:$false] %s1135_s4 }
  0x2d   : > { %p1133_p7 = pnand %p1131_p5, %p1119_p3  ;;  %s1137_s25 = scalar_lea.vmem %s1136_s4, 2048 }
  0x2e   : > { %p1138_p9 = scmp.lt.s32.totalorder %s203_s6, %s1136_s4  ;;  %p1139_p11 = scmp.lt.s32.totalorder %s1137_s25, %s1130_s10 }
  0x2f   : > { %p1134_p6 = pneg %p1133_p7 }
  0x30   : > { %p1140_p10 = por %p1139_p11, %p1138_p9 }
  0x32   : > { %p1141_p13 = pnand %p1140_p10, %p1134_p6 }
  0x34   : > { %1144 = shalt.err (!%p1141_p13)
}
  0x35   : > { %s1574_s8 = smov 4   ;;  %s1575_s18 = smov 64  }
  0x36   : > { %949 = dma.hbm_to_vmem [thread:$0]  (!%p1364_p2), %s201_s29, 1024, %s203_s6, %s191_s30, %s1575_s18, %s1575_s18, %s1574_s8  }
  0x37   : > { %214 = sbr.rel (%p1312_p8) target bundleno = 361 (0x169), region = 32  ;;  %s1378_s11 = sand.u32 (!%p1312_p8), 1, %s1213_s13  }
  0x38   : > { %s843_s4 = sshll.u32 (!%p1312_p8), %s1378_s11, 6  ;;  %s217_s26 = scalar_lea.sflag (!%p1312_p8), [#allocation4], %s1378_s11 }
  0x39   : > { %s1382_s27 = scalar_lea.vmem (!%p1312_p8), [#allocation3], %s843_s4 }
  0x3c   : > { %1196 = dma.done.wait (%p1302_p4), %s217_s26, 1024  }
  0x3d   : > { %1198 = vsyncadd (%p1302_p4), %s217_s26, 4294966272 }
  0x3e   : > { %1200 = dma.done.wait (%p1292_p1), [#allocation7], 1024  }
  0x3f   : > { %1202 = vsyncadd (%p1292_p1), [#allocation7], 4294966272  ;;  %v1011_v0 = vld [vmem:[#allocation6 + $0x38] sm:$0xff]   ;;  %v1012_v1 = vld [vmem:[#allocation6 + $0x30] sm:$0xff]   ;;  %s845_s24 = sshll.u32 %s1378_s11, 7  ;;  %s869_s29 = sshll.u32 %s1221_s15, 11 }
  0x40   : > { %886 = vmatprep.subr.bf16.mxu0 %v1011_v0  ;;  %918 = vmatprep.subr.bf16.mxu1 %v1011_v0  ;;  %v1013_v2 = vld [vmem:[#allocation6 + $0x28] sm:$0xff]   ;;  %v1014_v3 = vld [vmem:[#allocation6 + $0x20] sm:$0xff]   ;;  %v1015_v6 = vld [vmem:[#allocation6 + $0x18] sm:$0xff]   ;;  %s1472_s30 = scalar_lea.vmem [#allocation8], %s845_s24  ;;  %s1507_s10 = scalar_lea.hbm %s1561_s3, %s869_s29 }
  0x41   : > { %887 = vmatpush3.bf16.msra.mxu0 %v1011_v0  ;;  %926 = vmatpush3.bf16.msra.mxu1 %v1011_v0  ;;  %v1019_v4 = vld [vmem:[%s1382_s27] sm:$0xff]   ;;  %v1016_v7 = vld [vmem:[#allocation6 + $0x10] sm:$0xff]   ;;  %v1017_v8 = vld [vmem:[#allocation6 + $0x8] sm:$0xff]   ;;  %s719_s5 = sshll.u32 %s1472_s30, 4  ;;  %s705_s7 = scalar_lea.sflag [#allocation5], %s1378_s11  ;;  %s1509_s5 = int_to_ptr.vmem [resolvable:$true] %s719_s5 }
  0x42   : > { %888 = vmatprep.subr.bf16.mxu0 %v1012_v1  ;;  %919 = vmatprep.subr.bf16.mxu1 %v1012_v1  ;;  %v1020_v5 = vld [vmem:[%s1382_s27 + $0x20] sm:$0xff]   ;;  %v1021_v10 = vld [vmem:[%s1382_s27 + $0x8] sm:$0xff]   ;;  %v1023_v12 = vld [vmem:[%s1382_s27 + $0x10] sm:$0xff]   ;;  %s1145_s25 = scalar_lea.vmem %s1509_s5, 2048  ;;  %p1576_p4 = scmp.ne.s32.totalorder %s1572_s9, 0 }
  0x43   : > { %902 = vmatprep.mubr.bf16.mxu0 %v1019_v4  ;;  %910 = vmatprep.mubr.bf16.mxu1 %v1020_v5  ;;  %v1018_v9 = vld [vmem:[#allocation6] sm:$0xff]   ;;  %v1022_v11 = vld [vmem:[%s1382_s27 + $0x28] sm:$0xff]   ;;  %v1024_v13 = vld [vmem:[%s1382_s27 + $0x30] sm:$0xff]   ;;  %p1146_p1 = scmp.ne.s32.totalorder %s1509_s5, %s1145_s25  ;;  %s1235_s15 = smov [#allocation8]  }
  0x44   : > { %v1025_v14 = vld [vmem:[%s1382_s27 + $0x18] sm:$0xff]   ;;  %v1403_v16 = vld [vmem:[%s1560_s2] ss:$0 sm:$0xff]  ;;  %s1149_s8 = sshll.u32 %s1235_s15, 4  ;;  %s1150_s8 = int_to_ptr.vmem [resolvable:$false] %s1149_s8 }
  0x45   : > { %889 = vmatpush3.bf16.msra.mxu0 %v1012_v1  ;;  %927 = vmatpush3.bf16.msra.mxu1 %v1012_v1  ;;  %v1026_v15 = vld [vmem:[%s1382_s27 + $0x38] sm:$0xff]   ;;  %p1147_p8 = pnand %p1146_p1, %p1576_p4  ;;  %s1151_s18 = scalar_lea.vmem %s1150_s8, 4096 }
  0x46   : > { %890 = vmatprep.subr.bf16.mxu0 %v1013_v2  ;;  %920 = vmatprep.subr.bf16.mxu1 %v1013_v2  ;;  %p1152_p13 = scmp.lt.s32.totalorder %s1509_s5, %s1150_s8  ;;  %p1153_p0 = scmp.lt.s32.totalorder %s1151_s18, %s1145_s25 }
  0x47   : > { %p1148_p12 = pneg %p1147_p8 }
  0x48   : > { %p1154_p2 = por %p1153_p0, %p1152_p13 }
  0x49   : > { %891 = vmatpush3.bf16.msra.mxu0 %v1013_v2  ;;  %928 = vmatpush3.bf16.msra.mxu1 %v1013_v2 }
  0x4a   : > { %892 = vmatprep.subr.bf16.mxu0 %v1014_v3  ;;  %921 = vmatprep.subr.bf16.mxu1 %v1014_v3  ;;  %p1155_p3 = pnand %p1154_p2, %p1148_p12 }
  0x4d   : > { %893 = vmatpush3.bf16.msra.mxu0 %v1014_v3  ;;  %929 = vmatpush3.bf16.msra.mxu1 %v1014_v3 }
  0x4e   : > { %894 = vmatprep.subr.bf16.mxu0 %v1015_v6  ;;  %922 = vmatprep.subr.bf16.mxu1 %v1015_v6 }
  0x51   : > { %895 = vmatpush3.bf16.msra.mxu0 %v1015_v6  ;;  %930 = vmatpush3.bf16.msra.mxu1 %v1015_v6 }
  0x52   : > { %896 = vmatprep.subr.bf16.mxu0 %v1016_v7  ;;  %923 = vmatprep.subr.bf16.mxu1 %v1016_v7 }
  0x55   : > { %897 = vmatpush3.bf16.msra.mxu0 %v1016_v7  ;;  %931 = vmatpush3.bf16.msra.mxu1 %v1016_v7 }
  0x56   : > { %898 = vmatprep.subr.bf16.mxu0 %v1017_v8  ;;  %924 = vmatprep.subr.bf16.mxu1 %v1017_v8 }
  0x59   : > { %899 = vmatpush3.bf16.msra.mxu0 %v1017_v8  ;;  %932 = vmatpush3.bf16.msra.mxu1 %v1017_v8 }
  0x5a   : > { %900 = vmatprep.subr.bf16.mxu0 %v1018_v9  ;;  %925 = vmatprep.subr.bf16.mxu1 %v1018_v9 }
  0x5d   : > { %901 = vmatpush3.bf16.msra.mxu0 %v1018_v9  ;;  %933 = vmatpush3.bf16.msra.mxu1 %v1018_v9 }
  0x60   : > { %903 = vmatmul.mubr.bf16.vlgmr.msra.gmra.mxu0 %v1021_v10  ;;  %911 = vmatmul.mubr.bf16.vlgmr.msra.gmra.mxu1 %v1022_v11 }
  0x61   : > { %906 = vmatprep.mubr.bf16.mxu0 %v1023_v12  ;;  %914 = vmatprep.mubr.bf16.mxu1 %v1024_v13 }
  0x68   : > { %907 = vmatmul.mubr.bf16.gmra.mxu0 %v1025_v14  ;;  %915 = vmatmul.mubr.bf16.gmra.mxu1 %v1026_v15 }
 0x120   : > { %v904_v17 = vpop.f32.mrf.mxu0  ;;  %v912_v18 = vpop.f32.mrf.mxu1 }
 0x121   : > { %v1406_v19 = vadd.f32 %v904_v17, %v1403_v16  ;;  %v1409_v20 = vadd.f32 %v912_v18, %v1403_v16 }
 0x122   : > { %v455_v21 = vpop.f32.mrf.mxu0  ;;  %v487_v22 = vpop.f32.mrf.mxu1 }
 0x123   : > { %v594_v23 = vsub.f32 0.0, %v1406_v19  ;;  %v602_v24 = vsub.f32 0.0, %v1409_v20  ;;  %v1414_v25 = vadd.f32 %v1403_v16, %v455_v21  ;;  %v1417_v26 = vadd.f32 %v1403_v16, %v487_v22 }
 0x124   : > { %v905_v27 = vpop.f32.mrf.mxu0  ;;  %v913_v28 = vpop.f32.mrf.mxu1 }
 0x125   : > { %v612_v29 = vmul.f32 1.442695, %v594_v23  ;;  %v628_v30 = vmul.f32 1.442695, %v602_v24  ;;  %v592_v31 = vsub.f32 0.0, %v1414_v25  ;;  %v600_v32 = vsub.f32 0.0, %v1417_v26 }
 0x126   : > { %v1422_v33 = vadd.f32 %v905_v27, %v1403_v16  ;;  %v1425_v34 = vadd.f32 %v913_v28, %v1403_v16  ;;  %v458_v35 = vpop.f32.mrf.mxu0  ;;  %v490_v36 = vpop.f32.mrf.mxu1 }
 0x127   : > { %1027 = vpow2.f32 %v612_v29  ;;  %v608_v37 = vmul.f32 1.442695, %v592_v31  ;;  %v624_v38 = vmul.f32 1.442695, %v600_v32  ;;  %v1428_v39 = vadd.f32 %v1403_v16, %v458_v35 }
 0x128   : > { %1029 = vpow2.f32 %v628_v30  ;;  %v595_v40 = vsub.f32 0.0, %v1422_v33  ;;  %v603_v41 = vsub.f32 0.0, %v1425_v34  ;;  %v1433_v42 = vadd.f32 %v1403_v16, %v490_v36  ;;  %v908_v43 = vpop.f32.mrf.mxu0  ;;  %v916_v44 = vpop.f32.mrf.mxu1 }
 0x129   : > { %1031 = vpow2.f32 %v608_v37  ;;  %v593_v45 = vsub.f32 0.0, %v1428_v39  ;;  %v1437_v46 = vadd.f32 %v908_v43, %v1403_v16  ;;  %v1440_v47 = vadd.f32 %v916_v44, %v1403_v16 }
 0x12a   : > { %1033 = vpow2.f32 %v624_v38  ;;  %v614_v48 = vmul.f32 1.442695, %v595_v40  ;;  %v630_v49 = vmul.f32 1.442695, %v603_v41  ;;  %v601_v50 = vsub.f32 0.0, %v1433_v42  ;;  %v471_v51 = vpop.f32.mrf.mxu0  ;;  %v503_v52 = vpop.f32.mrf.mxu1 }
 0x12b   : > { %v610_v53 = vmul.f32 1.442695, %v593_v45  ;;  %v598_v54 = vsub.f32 0.0, %v1437_v46  ;;  %v606_v55 = vsub.f32 0.0, %v1440_v47  ;;  %v1446_v56 = vadd.f32 %v1403_v16, %v471_v51 }
 0x12c   : > { %1035 = vpow2.f32 %v614_v48  ;;  %v626_v57 = vmul.f32 1.442695, %v601_v50  ;;  %v1449_v58 = vadd.f32 %v1403_v16, %v503_v52  ;;  %v909_v59 = vpop.f32.mrf.mxu0  ;;  %v917_v60 = vpop.f32.mrf.mxu1 }
 0x12d   : > { %1037 = vpow2.f32 %v630_v49  ;;  %v620_v61 = vmul.f32 1.442695, %v598_v54  ;;  %v636_v62 = vmul.f32 1.442695, %v606_v55  ;;  %v596_v63 = vsub.f32 0.0, %v1446_v56 }
 0x12e   : > { %1039 = vpow2.f32 %v610_v53  ;;  %v604_v0 = vsub.f32 0.0, %v1449_v58  ;;  %v1454_v1 = vadd.f32 %v909_v59, %v1403_v16  ;;  %v1457_v2 = vadd.f32 %v917_v60, %v1403_v16  ;;  %v474_v3 = vpop.f32.mrf.mxu0  ;;  %v506_v4 = vpop.f32.mrf.mxu1 }
 0x12f   : > { %1041 = vpow2.f32 %v626_v57  ;;  %v616_v5 = vmul.f32 1.442695, %v596_v63  ;;  %v1460_v6 = vadd.f32 %v1403_v16, %v474_v3  ;;  %v1463_v7 = vadd.f32 %v1403_v16, %v506_v4 }
 0x130   : > { %1043 = vpow2.f32 %v620_v61  ;;  %v632_v8 = vmul.f32 1.442695, %v604_v0  ;;  %v599_v9 = vsub.f32 0.0, %v1454_v1  ;;  %v607_v10 = vsub.f32 0.0, %v1457_v2 }
 0x131   : > { %1045 = vpow2.f32 %v636_v62  ;;  %v597_v11 = vsub.f32 0.0, %v1460_v6  ;;  %v605_v15 = vsub.f32 0.0, %v1463_v7 }
 0x132   : > { %1047 = vpow2.f32 %v616_v5  ;;  %v622_v12 = vmul.f32 1.442695, %v599_v9  ;;  %v638_v13 = vmul.f32 1.442695, %v607_v10 }
 0x133   : > { %1049 = vpow2.f32 %v632_v8  ;;  %v618_v14 = vmul.f32 1.442695, %v597_v11  ;;  %v634_v27 = vmul.f32 1.442695, %v605_v15 }
 0x134   : > { %v1028_v17 = vpop.eup %1027  ;;  %1051 = vpow2.f32 %v622_v12 }
 0x135   : > { %v1030_v16 = vpop.eup %1029  ;;  %v642_v18 = vadd.f32 1.0, %v1028_v17  ;;  %1053 = vpow2.f32 %v638_v13 }
 0x136   : > { %v1032_v21 = vpop.eup %1031  ;;  %v650_v22 = vadd.f32 1.0, %v1030_v16  ;;  %1055 = vpow2.f32 %v618_v14 }
 0x137   : > { %v1034_v23 = vpop.eup %1033  ;;  %1057 = vrcp.f32 %v642_v18  ;;  %v640_v24 = vadd.f32 1.0, %v1032_v21 }
 0x138   : > { %1059 = vrcp.f32 %v650_v22  ;;  %v648_v28 = vadd.f32 1.0, %v1034_v23 }
 0x139   : > { %v1036_v29 = vpop.eup %1035  ;;  %1061 = vrcp.f32 %v640_v24 }
 0x13a   : > { %v1038_v30 = vpop.eup %1037  ;;  %1063 = vrcp.f32 %v648_v28  ;;  %v643_v31 = vadd.f32 1.0, %v1036_v29 }
 0x13b   : > { %v1040_v32 = vpop.eup %1039  ;;  %v651_v35 = vadd.f32 1.0, %v1038_v30  ;;  %1065 = vpow2.f32 %v634_v27 }
 0x13c   : > { %v1042_v36 = vpop.eup %1041  ;;  %1067 = vrcp.f32 %v643_v31  ;;  %v641_v37 = vadd.f32 1.0, %v1040_v32 }
 0x13d   : > { %v1044_v38 = vpop.eup %1043  ;;  %1069 = vrcp.f32 %v651_v35  ;;  %v649_v40 = vadd.f32 1.0, %v1042_v36 }
 0x13e   : > { %v1046_v41 = vpop.eup %1045  ;;  %1071 = vrcp.f32 %v641_v37  ;;  %v646_v43 = vadd.f32 1.0, %v1044_v38 }
 0x13f   : > { %v1048_v44 = vpop.eup %1047  ;;  %1073 = vrcp.f32 %v649_v40  ;;  %v654_v45 = vadd.f32 1.0, %v1046_v41 }
 0x140   : > { %v1050_v48 = vpop.eup %1049  ;;  %1075 = vrcp.f32 %v646_v43  ;;  %v644_v49 = vadd.f32 1.0, %v1048_v44 }
 0x141   : > { %v1052_v50 = vpop.eup %1051  ;;  %1077 = vrcp.f32 %v654_v45  ;;  %v652_v51 = vadd.f32 1.0, %v1050_v48 }
 0x142   : > { %v1054_v52 = vpop.eup %1053  ;;  %1079 = vrcp.f32 %v644_v49  ;;  %v647_v53 = vadd.f32 1.0, %v1052_v50 }
 0x143   : > { %v1056_v54 = vpop.eup %1055  ;;  %1081 = vrcp.f32 %v652_v51  ;;  %v655_v55 = vadd.f32 1.0, %v1054_v52 }
 0x144   : > { %v1058_v57 = vpop.eup %1057  ;;  %1083 = vrcp.f32 %v647_v53  ;;  %v645_v59 = vadd.f32 1.0, %v1056_v54 }
 0x145   : > { %v1060_v60 = vpop.eup %1059  ;;  %v674_v61 = vmul.f32 %v1058_v57, %v1406_v19  ;;  %1085 = vrcp.f32 %v655_v55 }
 0x146   : > { %v1062_v62 = vpop.eup %1061  ;;  %v682_v63 = vmul.f32 %v1060_v60, %v1409_v20  ;;  %1087 = vrcp.f32 %v645_v59 }
 0x147   : > { %v1064_v0 = vpop.eup %1063  ;;  %690 = vst [vmem:[%s1472_s30 + $0x10] sm:$0xff] %v674_v61  ;;  %v672_v3 = vmul.f32 %v1062_v62, %v1414_v25 }
 0x148   : > { %v1066_v4 = vpop.eup %1065  ;;  %698 = vst [vmem:[%s1472_s30 + $0x50] sm:$0xff] %v682_v63  ;;  %v680_v19 = vmul.f32 %v1064_v0, %v1417_v26 }
 0x149   : > { %v1068_v5 = vpop.eup %1067  ;;  %688 = vst [vmem:[%s1472_s30] sm:$0xff] %v672_v3  ;;  %v653_v20 = vadd.f32 1.0, %v1066_v4 }
 0x14a   : > { %v1070_v8 = vpop.eup %1069  ;;  %696 = vst [vmem:[%s1472_s30 + $0x40] sm:$0xff] %v680_v19  ;;  %v675_v9 = vmul.f32 %v1068_v5, %v1422_v33 }
 0x14b   : > { %v1072_v10 = vpop.eup %1071  ;;  %v683_v11 = vmul.f32 %v1070_v8, %v1425_v34  ;;  %1089 = vrcp.f32 %v653_v20 }
 0x14c   : > { %v1074_v25 = vpop.eup %1073  ;;  %691 = vst [vmem:[%s1472_s30 + $0x18] sm:$0xff] %v675_v9  ;;  %v673_v12 = vmul.f32 %v1072_v10, %v1428_v39 }
 0x14d   : > { %v1076_v26 = vpop.eup %1075  ;;  %699 = vst [vmem:[%s1472_s30 + $0x58] sm:$0xff] %v683_v11  ;;  %v681_v13 = vmul.f32 %v1074_v25, %v1433_v42 }
 0x14e   : > { %v1078_v14 = vpop.eup %1077  ;;  %689 = vst [vmem:[%s1472_s30 + $0x8] sm:$0xff] %v673_v12  ;;  %v678_v33 = vmul.f32 %v1076_v26, %v1437_v46 }
 0x14f   : > { %v1080_v15 = vpop.eup %1079  ;;  %697 = vst [vmem:[%s1472_s30 + $0x48] sm:$0xff] %v681_v13  ;;  %v686_v34 = vmul.f32 %v1078_v14, %v1440_v47 }
 0x150   : > { %v1082_v17 = vpop.eup %1081  ;;  %694 = vst [vmem:[%s1472_s30 + $0x30] sm:$0xff] %v678_v33  ;;  %v676_v39 = vmul.f32 %v1080_v15, %v1446_v56 }
 0x151   : > { %v1084_v16 = vpop.eup %1083  ;;  %702 = vst [vmem:[%s1472_s30 + $0x70] sm:$0xff] %v686_v34  ;;  %v684_v42 = vmul.f32 %v1082_v17, %v1449_v58 }
 0x152   : > { %v1086_v18 = vpop.eup %1085  ;;  %692 = vst [vmem:[%s1472_s30 + $0x20] sm:$0xff] %v676_v39  ;;  %v679_v46 = vmul.f32 %v1084_v16, %v1454_v1 }
 0x153   : > { %v1088_v21 = vpop.eup %1087  ;;  %700 = vst [vmem:[%s1472_s30 + $0x60] sm:$0xff] %v684_v42  ;;  %v687_v47 = vmul.f32 %v1086_v18, %v1457_v2 }
 0x154   : > { %695 = vst [vmem:[%s1472_s30 + $0x38] sm:$0xff] %v679_v46  ;;  %v677_v22 = vmul.f32 %v1088_v21, %v1460_v6 }
 0x155   : > { %703 = vst [vmem:[%s1472_s30 + $0x78] sm:$0xff] %v687_v47 }
 0x156   : > { %693 = vst [vmem:[%s1472_s30 + $0x28] sm:$0xff] %v677_v22 }
 0x158   : > { %v1090_v56 = vpop.eup %1089 }
 0x159   : > { %v685_v58 = vmul.f32 %v1090_v56, %v1463_v7 }
 0x15b   : > { %701 = vst [vmem:[%s1472_s30 + $0x68] sm:$0xff] %v685_v58 }
 0x15c   : > { %1158 = shalt.err (!%p1155_p3)
}
 0x15d   : > { %s1159_s4 = scalar_lea.hbm %s1507_s10, 2048  ;;  %s1163_s20 = scalar_lea.hbm %s1561_s3, 8192 }
 0x15e   : > { %p1160_p5 = scmp.ne.s32.totalorder %s1507_s10, %s1159_s4  ;;  %p1164_p9 = scmp.lt.s32.totalorder %s1507_s10, %s1561_s3 }
 0x15f   : > { %p1165_p11 = scmp.lt.s32.totalorder %s1163_s20, %s1159_s4 }
 0x160   : > { %p1161_p7 = pnand %p1160_p5, %p1576_p4 }
 0x161   : > { %p1166_p10 = por %p1165_p11, %p1164_p9 }
 0x162   : > { %p1162_p6 = pneg %p1161_p7 }
 0x164   : > { %p1167_p1 = pnand %p1166_p10, %p1162_p6 }
 0x166   : > { %1170 = shalt.err (!%p1167_p1)
}
 0x167   : > { %s1236_s30 = smov 128   ;;  %s1237_s29 = smov 8  }
 0x168   : > { %940 = dma.vmem_to_hbm [thread:$0]  (%p1576_p4), %s1509_s5, 2048, %s1507_s10, %s705_s7, %s1236_s30, %s1236_s30, %s1237_s29  }
 0x169 PF: > { %p957_p8 = scmp.ge.s32.totalorder %s1229_s17, 2  ;;  %s734_s6 = sand.u32 1, %s1209_s12  }
 0x16a   : > { %p1577_p12 = scmp.ne.s32.totalorder %s1568_s23, 0  ;;  %s735_s21 = scalar_lea.sflag [#allocation5], %s734_s6 }
 0x16c   : > { %p951_p13 = pnand %p957_p8, %p1577_p12 }
 0x16e   : > { %p952_p0 = pneg %p951_p13 }
 0x170   : > { %1204 = dma.done.wait (%p952_p0), %s735_s21, 2048  }
 0x171   : > { %1206 = vsyncadd (%p952_p0), %s735_s21, 4294965248  ;;  %s20_s17 = sadd.s32 1, %s1229_s17   ;;  %s1578_s12 = smov %s1213_s13 }
 0x172   : > { %p17_p2 = scmp.ge.s32.totalorder %s20_s17, 6   ;;  %s1579_s13 = smov %s1217_s14 }
 0x173   : > { %s1580_s14 = smov %s1356_s19  ;;  %s1581_s15 = smov %s1225_s16 }
 0x174   : > { %s1582_s16 = smov %s1584_s28  ;;  %19 = sbr.rel (!%p17_p2) target bundleno = 7 (0x7), region = 93 }
 0x179   :  { %740 = vsyncpa [#allocation4], 1 }
 0x17a   :  { %742 = vsyncpa [#allocation4 + $0x1], 1 }
 0x17b   :  { %743 = vsyncpa [#allocation7], 1 }
 0x17c   :  { %744 = vsyncpa [#allocation5], 1 }
 0x17d   :  { %746 = vsyncpa [#allocation5 + $0x1], 1 }

</bundles_post_ra>
